<compile_context>
chip_gen: v7x
topology: tpu7x:2x2x1
jax: 0.10.0
libtpu: 0.0.40
codegen_flags: <defaults>
</compile_context>

<pallas_src>
import functools
import math

import jax
import jax.numpy as jnp
import numpy as np
from jax.experimental import pallas as pl
from jax.experimental.pallas import tpu as pltpu

_TARGET_TILE_BYTES = 4 * 1024 * 1024      # per-buffer tile target (~4 MiB)
_VMEM_LIMIT_BYTES = 32 * 1024 * 1024      # safe on v5e/v6e (128 MiB) and v7x (64 MiB)
_WIDE_LANE_CANDIDATES = (4096, 2048, 1024, 512, 256, 128)


def _bias_correction_kernel(w_ref, b_ref, x_ref, o_ref):
    """y = w * x + b, elementwise.

    w_ref, b_ref: SMEM f32 scalars, shape (1,).
    x_ref, o_ref: VMEM row-tiles in the input's native dtype.
    """
    x = x_ref[...]
    y = x.astype(jnp.float32) * w_ref[0] + b_ref[0]
    o_ref[...] = y.astype(o_ref.dtype)


def _choose_2d_view(shape):
    """Pick a lane-dense (rows, cols) view of the flattened input (bitcast-only reshape)."""
    n = math.prod(shape)
    # Prefer a wide multiple-of-128 trailing dim; first try to keep >= 8 rows
    # (full sublanes), then accept fewer rows for small inputs.
    for min_rows in (8, 1):
        for cols in _WIDE_LANE_CANDIDATES:
            if n % cols == 0 and n // cols >= min_rows:
                return n // cols, cols
    # Fall back to the array's own trailing dim (block dim == full array dim is
    # always legal even when not a multiple of 128).
    if len(shape) >= 2:
        return n // shape[-1], shape[-1]
    return 1, n


def _choose_tile_rows(rows, cols, itemsize, tile_bytes):
    sub = max(8, 32 // itemsize)          # sublane multiple: 8 (f32) / 16 (bf16) / 32 (i8)
    row_bytes = cols * itemsize
    if rows * row_bytes <= tile_bytes:
        return rows                       # single tile; block == full array dims
    tile_rows = max(sub, (tile_bytes // row_bytes) // sub * sub)
    return min(tile_rows, rows)


@functools.partial(jax.jit, static_argnames=("tile_bytes",))
def bias_correction_forward(x, weight, bias, *, tile_bytes=_TARGET_TILE_BYTES):
    """Forward pass of BiasCorrectionLayer: y = w * x + b (same shape/dtype as x)."""
    orig_shape = x.shape
    rows, cols = _choose_2d_view(orig_shape)
    x2 = x.reshape(rows, cols)            # contiguous row-major reshape: no copy

    tile_rows = _choose_tile_rows(rows, cols, x2.dtype.itemsize, tile_bytes)
    grid = (pl.cdiv(rows, tile_rows),)    # ragged last tile handled by Pallas masking

    w_s = weight.reshape(1).astype(jnp.float32)
    b_s = bias.reshape(1).astype(jnp.float32)

    out2 = pl.pallas_call(
        _bias_correction_kernel,
        out_shape=jax.ShapeDtypeStruct((rows, cols), x2.dtype),
        grid_spec=pltpu.PrefetchScalarGridSpec(
            num_scalar_prefetch=0,
            grid=grid,
            in_specs=[
                pl.BlockSpec(memory_space=pltpu.MemorySpace.SMEM),    # w (scalar)
                pl.BlockSpec(memory_space=pltpu.MemorySpace.SMEM),    # b (scalar)
                pl.BlockSpec((tile_rows, cols), lambda i: (i, 0)),    # x row-tile
            ],
            out_specs=pl.BlockSpec((tile_rows, cols), lambda i: (i, 0)),
        ),
        compiler_params=pltpu.CompilerParams(
            dimension_semantics=("parallel",),     # shard row tiles across TCs
            vmem_limit_bytes=_VMEM_LIMIT_BYTES,
        ),
    )(w_s, b_s, x2)

    return out2.reshape(orig_shape)


def reference_forward(x, weight, bias):
    """Pure-JAX reference: Linear(1,1) on unsqueezed last dim == scalar affine."""
    w = weight.reshape(()).astype(jnp.float32)
    b = bias.reshape(()).astype(jnp.float32)
    return (x.astype(jnp.float32) * w + b).astype(x.dtype)


if __name__ == "__main__":
    key = jax.random.PRNGKey(0)
    # Small shape matching the module's usage (bias-correcting [batch, n_classes] logits).
    x = jax.random.normal(key, (2, 32), dtype=jnp.float32)

    # Default init: weight = 1.0, bias = 0.0 (identity).
    weight = jnp.full((1, 1), 1.0, dtype=jnp.float32)
    bias = jnp.zeros((1,), dtype=jnp.float32)
    out = jax.block_until_ready(bias_correction_forward(x, weight, bias))
    ref = jax.block_until_ready(reference_forward(x, weight, bias))
    np.testing.assert_allclose(np.asarray(out), np.asarray(ref), rtol=1e-6, atol=1e-6)

    # Learned (non-trivial) parameters to verify the affine math.
    weight2 = jnp.full((1, 1), 1.25, dtype=jnp.float32)
    bias2 = jnp.full((1,), -0.5, dtype=jnp.float32)
    out2 = jax.block_until_ready(bias_correction_forward(x, weight2, bias2))
    ref2 = jax.block_until_ready(reference_forward(x, weight2, bias2))
    np.testing.assert_allclose(np.asarray(out2), np.asarray(ref2), rtol=1e-6, atol=1e-6)

    # Ragged, multi-tile case (small tile target forces several row tiles plus a
    # masked boundary tile) — exercises the no-pad / no-slice path.
    x3 = jax.random.normal(jax.random.PRNGKey(0), (37, 100), dtype=jnp.float32)
    out3 = jax.block_until_ready(
        bias_correction_forward(x3, weight2, bias2, tile_bytes=4096))
    ref3 = jax.block_until_ready(reference_forward(x3, weight2, bias2))
    np.testing.assert_allclose(np.asarray(out3), np.asarray(ref3), rtol=1e-6, atol=1e-6)

    # Native-bf16 path (no wrapper up-cast; in-kernel f32 FMA, bf16 store).
    x4 = jax.random.normal(jax.random.PRNGKey(0), (16, 256)).astype(jnp.bfloat16)
    out4 = jax.block_until_ready(bias_correction_forward(x4, weight2, bias2))
    ref4 = jax.block_until_ready(reference_forward(x4, weight2, bias2))
    np.testing.assert_allclose(np.asarray(out4, dtype=np.float32),
                               np.asarray(ref4, dtype=np.float32), rtol=1e-2, atol=1e-2)

    print("KERNEL_OK")
</pallas_src>

<mosaic_0001>
module attributes {stable_mosaic.version = 11 : i64} {
  func.func @_bias_correction_kernel(%arg0: i32, %arg1: memref<1xf32, #tpu.memory_space<smem>>, %arg2: memref<1xf32, #tpu.memory_space<smem>>, %arg3: memref<2x32xf32, #tpu.memory_space<vmem>>, %arg4: memref<2x32xf32, #tpu.memory_space<vmem>>) attributes {dimension_semantics = [#tpu.dimension_semantics<parallel>], iteration_bounds = array<i64: 1>, scalar_prefetch = 0 : i64, scratch_operands = 0 : i64, tpu.core_type = #tpu.core_type<tc>, window_params = [{transform_indices = @transform_0, window_bounds = array<i64: 1>}, {transform_indices = @transform_1, window_bounds = array<i64: 1>}, {transform_indices = @transform_2, window_bounds = array<i64: 2, 32>}, {transform_indices = @transform_3, window_bounds = array<i64: 2, 32>}]} {
    %c0 = arith.constant 0 : index
    %c0_0 = arith.constant 0 : index
    %0 = vector.load %arg3[%c0, %c0_0] : memref<2x32xf32, #tpu.memory_space<vmem>>, vector<2x32xf32>
    %c0_1 = arith.constant 0 : index
    %1 = memref.load %arg1[%c0_1] : memref<1xf32, #tpu.memory_space<smem>>
    %2 = vector.broadcast %1 : f32 to vector<2x32xf32>
    %3 = arith.mulf %0, %2 : vector<2x32xf32>
    %c0_2 = arith.constant 0 : index
    %4 = memref.load %arg2[%c0_2] : memref<1xf32, #tpu.memory_space<smem>>
    %5 = vector.broadcast %4 : f32 to vector<2x32xf32>
    %6 = arith.addf %3, %5 : vector<2x32xf32>
    %c0_3 = arith.constant 0 : index
    %c0_4 = arith.constant 0 : index
    %7 = vector.load %arg4[%c0_3, %c0_4] : memref<2x32xf32, #tpu.memory_space<vmem>>, vector<2x32xf32>
    tpu.vector_store %arg4[%c0_3, %c0_4], %6 {strides = array<i32>} : memref<2x32xf32, #tpu.memory_space<vmem>>, vector<2x32xf32>,
    return
  }
  func.func @transform_0(%arg0: i32) -> i32 {
    %c0_i32 = arith.constant 0 : i32
    %c0_i32_0 = arith.constant 0 : i32
    return %c0_i32 : i32
  }
  func.func @transform_1(%arg0: i32) -> i32 {
    %c0_i32 = arith.constant 0 : i32
    %c0_i32_0 = arith.constant 0 : i32
    return %c0_i32 : i32
  }
  func.func @transform_2(%arg0: i32) -> (i32, i32) {
    %c0_i32 = arith.constant 0 : i32
    %c0_i32_0 = arith.constant 0 : i32
    return %arg0, %c0_i32 : i32, i32
  }
  func.func @transform_3(%arg0: i32) -> (i32, i32) {
    %c0_i32 = arith.constant 0 : i32
    %c0_i32_0 = arith.constant 0 : i32
    return %arg0, %c0_i32 : i32, i32
  }
}

</mosaic_0001>

<bundles_post_ra>
// kernel: bias_correction_forward.1
= control target key start
LH: loop header
LB: loop body
LE: loop exit
PB: predicated region body
PF: predicated region fallthrough
CT: control target
= control target key end

     0   :  { %s107_s0 = inlined_call_operand.<no memory space> [shape: f32[1], index: 0, kind: input, shape index: {}]   ;;  %s108_s1 = inlined_call_operand.<no memory space> [shape: f32[1], index: 1, kind: input, shape index: {}]   ;;  %s109_s2 = inlined_call_operand.vmem [shape: f32[2,32], index: 2, kind: input, shape index: {}]   ;;  %s110_s3 = inlined_call_operand.hbm [shape: f32[2,32], index: 3, kind: output, shape index: {}]  }
   0x1   :  { %v17_v0 = vld [vmem:[%s109_s2] sm:$0x3]  ;;  %v19_v1 = vstv %s107_s0  ;;  %v22_v2 = vstv %s108_s1 }
   0x2   :  { %10 = vsyncpa [#allocation5], 0  ;;  %v20_v3 = vmul.f32 %v19_v1, %v17_v0  ;;  %s65_s18 = smov [#allocation4]   ;;  %vm24_vm0 = vcmask 254976  }
   0x3   :  { %s32_s19 = sshll.u32 %s65_s18, 4  ;;  %s33_s19 = int_to_ptr.vmem [resolvable:$true] %s32_s19 }
   0x4   :  { %v23_v4 = vadd.f32 %v22_v2, %v20_v3  ;;  %s41_s20 = scalar_lea.vmem %s33_s19, 32  ;;  %p46_p1 = scmp.lt.s32.totalorder %s33_s19, %s33_s19 }
   0x5   :  { %p42_p0 = scmp.ne.s32.totalorder %s33_s19, %s41_s20  ;;  %p47_p2 = scmp.lt.s32.totalorder %s41_s20, %s41_s20 }
   0x6   :  { %25 = vst.msk [vmem:[#allocation4] sm:$0x3] %vm24_vm0, %v23_v4 }
   0x7   :  { %p48_p3 = por %p47_p2, %p46_p1 }
   0x9   :  { %p49_p4 = pnand %p48_p3, %p42_p0 }
   0xb   :  { %52 = shalt.err (!%p49_p4)
}
   0xc   :  { %s53_s21 = scalar_lea.hbm %s110_s3, 32 }
   0xd   :  { %p54_p5 = scmp.ne.s32.totalorder %s110_s3, %s53_s21  ;;  %p57_p6 = scmp.lt.u32.totalorder %s53_s21, %s110_s3 }
   0xf   :  { %p59_p7 = pnand %p57_p6, %p54_p5 }
  0x11   :  { %62 = shalt.err (!%p59_p7)
}
  0x12   :  { %35 = dma.vmem_to_hbm [thread:$0]  %s33_s19, 32, %s110_s3, [#allocation5]  }
  0x13   :  { %63 = dma.done.wait [#allocation5], 32  }
  0x14   :  { %64 = vsyncadd [#allocation5], 4294967264 }
  0x15   :  { %39 = vsyncpa [#allocation5], 1 }

</bundles_post_ra>
